<compile_context>
chip_gen: v6e
topology: v6e:2x2x1
jax: 0.10.0
libtpu: 0.0.40
codegen_flags: <defaults>
</compile_context>

<pallas_src>
import jax
import jax.numpy as jnp
from jax.experimental import pallas as pl
from jax.experimental.pallas import tpu as pltpu

INPUT_DIM = 4
HIDDEN_DIM = 25
OUTPUT_DIM = 2

SUBLANE = 8
DEFAULT_TB = 8192          # batch rows per grid step (lane-padded VMEM blocks)
MIN_SPLIT = 2048           # only force a >=2-step grid when B is at least 2x this
VMEM_LIMIT_BYTES = 48 * 1024 * 1024


def _round_up(n, m):
    return ((n + m - 1) // m) * m


def _mlp_kernel(x_ref, w1t_ref, b1_ref, w2t_ref, b2_ref, o_ref):
    # x_ref: (TB, 4) batch-major block; weights are resident across the grid.
    x = x_ref[...]
    # Layer 1: (TB, 4) @ (4, 25) -> (TB, 25), accumulate in f32.
    z = jnp.dot(x, w1t_ref[...], preferred_element_type=jnp.float32)
    z = z + b1_ref[...]                       # bias (1, 25) broadcasts over rows
    # sigmoid(z) = 0.5 * tanh(0.5 * z) + 0.5  -> single EUP transcendental.
    h = 0.5 * jnp.tanh(0.5 * z) + 0.5
    # Layer 2: (TB, 25) @ (25, 2) -> (TB, 2)
    y = jnp.dot(h, w2t_ref[...], preferred_element_type=jnp.float32)
    o_ref[...] = (y + b2_ref[...]).astype(o_ref.dtype)


def mlp_forward(x, w1, b1, w2, b2, *, tb=DEFAULT_TB):
    """x: (B, 4) f32; w1: (25, 4); b1: (25,); w2: (2, 25); b2: (2,). Returns (B, 2)."""
    B = x.shape[0]

    # Batch tile: either the whole batch (block == array dim is always legal)
    # or a sublane-aligned tile smaller than B.
    tb_eff = min(tb, B)
    if tb_eff < B:
        tb_eff = max(SUBLANE, (tb_eff // SUBLANE) * SUBLANE)
    # Make sure large batches produce >= 2 grid steps so both v7x TCs get work.
    if B >= 2 * MIN_SPLIT and pl.cdiv(B, tb_eff) < 2:
        tb_eff = _round_up((B + 1) // 2, SUBLANE)

    grid = (pl.cdiv(B, tb_eff),)

    # Tiny weight transposes (100 floats) + bias reshapes: done once, free.
    w1t = w1.T                                # (4, 25)
    w2t = w2.T                                # (25, 2)
    b1_row = b1.reshape(1, HIDDEN_DIM)
    b2_row = b2.reshape(1, OUTPUT_DIM)

    out = pl.pallas_call(
        _mlp_kernel,
        out_shape=jax.ShapeDtypeStruct((B, OUTPUT_DIM), x.dtype),
        grid=grid,
        in_specs=[
            # x: tiled along the batch (sublane) axis, native (B, 4) layout.
            pl.BlockSpec((tb_eff, INPUT_DIM), lambda i: (i, 0)),
            # Weights / biases: full arrays, resident across the whole grid.
            pl.BlockSpec((INPUT_DIM, HIDDEN_DIM), lambda i: (0, 0)),
            pl.BlockSpec((1, HIDDEN_DIM), lambda i: (0, 0)),
            pl.BlockSpec((HIDDEN_DIM, OUTPUT_DIM), lambda i: (0, 0)),
            pl.BlockSpec((1, OUTPUT_DIM), lambda i: (0, 0)),
        ],
        out_specs=pl.BlockSpec((tb_eff, OUTPUT_DIM), lambda i: (i, 0)),
        compiler_params=pltpu.CompilerParams(
            dimension_semantics=("parallel",),
            vmem_limit_bytes=VMEM_LIMIT_BYTES,
        ),
    )(x, w1t, b1_row, w2t, b2_row)

    return out


def init_params(key):
    """Deterministic init mimicking torch.nn.Linear default U[-1/sqrt(fan_in), ...].

    Weights are stored in PyTorch-native (out_features, in_features) layout.
    """
    k1, k2, k3, k4 = jax.random.split(key, 4)
    bound1 = 1.0 / jnp.sqrt(jnp.float32(INPUT_DIM))
    bound2 = 1.0 / jnp.sqrt(jnp.float32(HIDDEN_DIM))
    w1 = jax.random.uniform(k1, (HIDDEN_DIM, INPUT_DIM), jnp.float32, -bound1, bound1)
    b1 = jax.random.uniform(k2, (HIDDEN_DIM,), jnp.float32, -bound1, bound1)
    w2 = jax.random.uniform(k3, (OUTPUT_DIM, HIDDEN_DIM), jnp.float32, -bound2, bound2)
    b2 = jax.random.uniform(k4, (OUTPUT_DIM,), jnp.float32, -bound2, bound2)
    return w1, b1, w2, b2


def reference_forward(x, w1, b1, w2, b2):
    h = jax.nn.sigmoid(x @ w1.T + b1)
    return h @ w2.T + b2


if __name__ == "__main__":
    key = jax.random.PRNGKey(0)
    k_params, k_x = jax.random.split(key)
    w1, b1, w2, b2 = init_params(k_params)

    batch = 8
    x = jax.random.normal(k_x, (batch, INPUT_DIM), jnp.float32)

    y = mlp_forward(x, w1, b1, w2, b2)
    y = jax.block_until_ready(y)

    y_ref = reference_forward(x, w1, b1, w2, b2)
    assert y.shape == (batch, OUTPUT_DIM)
    assert jnp.allclose(y, y_ref, atol=1e-5, rtol=1e-5)

    print("KERNEL_OK")
</pallas_src>

<mosaic_0001>
module attributes {stable_mosaic.version = 11 : i64} {
  func.func @_mlp_kernel(%arg0: i32, %arg1: memref<8x4xf32, #tpu.memory_space<vmem>>, %arg2: memref<4x25xf32, #tpu.memory_space<vmem>>, %arg3: memref<1x25xf32, #tpu.memory_space<vmem>>, %arg4: memref<25x2xf32, #tpu.memory_space<vmem>>, %arg5: memref<1x2xf32, #tpu.memory_space<vmem>>, %arg6: memref<8x2xf32, #tpu.memory_space<vmem>>) attributes {dimension_semantics = [#tpu.dimension_semantics<parallel>], iteration_bounds = array<i64: 1>, scalar_prefetch = 0 : i64, scratch_operands = 0 : i64, tpu.core_type = #tpu.core_type<tc>, window_params = [{transform_indices = @transform_0, window_bounds = array<i64: 8, 4>}, {pipeline_mode = #tpu.pipeline_mode<synchronous>, transform_indices = @transform_1, window_bounds = array<i64: 4, 25>}, {pipeline_mode = #tpu.pipeline_mode<synchronous>, transform_indices = @transform_2, window_bounds = array<i64: 1, 25>}, {pipeline_mode = #tpu.pipeline_mode<synchronous>, transform_indices = @transform_3, window_bounds = array<i64: 25, 2>}, {pipeline_mode = #tpu.pipeline_mode<synchronous>, transform_indices = @transform_4, window_bounds = array<i64: 1, 2>}, {transform_indices = @transform_5, window_bounds = array<i64: 8, 2>}]} {
    %c0 = arith.constant 0 : index
    %c0_0 = arith.constant 0 : index
    %0 = vector.load %arg1[%c0, %c0_0] : memref<8x4xf32, #tpu.memory_space<vmem>>, vector<8x4xf32>
    %c0_1 = arith.constant 0 : index
    %c0_2 = arith.constant 0 : index
    %1 = vector.load %arg2[%c0_1, %c0_2] : memref<4x25xf32, #tpu.memory_space<vmem>>, vector<4x25xf32>
    %cst = arith.constant dense<0.000000e+00> : vector<8x25xf32>
    %2 = tpu.matmul %0, %1, %cst {dimension_numbers = #tpu.dot_dimension_numbers<[1], [0], [0], [1], [0, 0, 1, 1], [], []>} : vector<8x4xf32>, vector<4x25xf32>, vector<8x25xf32> -> vector<8x25xf32>
    %c0_3 = arith.constant 0 : index
    %c0_4 = arith.constant 0 : index
    %3 = vector.load %arg3[%c0_3, %c0_4] : memref<1x25xf32, #tpu.memory_space<vmem>>, vector<1x25xf32>
    %4 = vector.broadcast %3 : vector<1x25xf32> to vector<8x25xf32>
    %5 = arith.addf %2, %4 : vector<8x25xf32>
    %cst_5 = arith.constant 5.000000e-01 : f32
    %6 = vector.broadcast %cst_5 : f32 to vector<8x25xf32>
    %7 = arith.mulf %6, %5 : vector<8x25xf32>
    %8 = math.tanh %7 : vector<8x25xf32>
    %cst_6 = arith.constant 5.000000e-01 : f32
    %9 = vector.broadcast %cst_6 : f32 to vector<8x25xf32>
    %10 = arith.mulf %9, %8 : vector<8x25xf32>
    %cst_7 = arith.constant 5.000000e-01 : f32
    %11 = vector.broadcast %cst_7 : f32 to vector<8x25xf32>
    %12 = arith.addf %10, %11 : vector<8x25xf32>
    %c0_8 = arith.constant 0 : index
    %c0_9 = arith.constant 0 : index
    %13 = vector.load %arg4[%c0_8, %c0_9] : memref<25x2xf32, #tpu.memory_space<vmem>>, vector<25x2xf32>
    %cst_10 = arith.constant dense<0.000000e+00> : vector<8x2xf32>
    %14 = tpu.matmul %12, %13, %cst_10 {dimension_numbers = #tpu.dot_dimension_numbers<[1], [0], [0], [1], [0, 0, 1, 1], [], []>} : vector<8x25xf32>, vector<25x2xf32>, vector<8x2xf32> -> vector<8x2xf32>
    %c0_11 = arith.constant 0 : index
    %c0_12 = arith.constant 0 : index
    %15 = vector.load %arg5[%c0_11, %c0_12] : memref<1x2xf32, #tpu.memory_space<vmem>>, vector<1x2xf32>
    %16 = vector.broadcast %15 : vector<1x2xf32> to vector<8x2xf32>
    %17 = arith.addf %14, %16 : vector<8x2xf32>
    %c0_13 = arith.constant 0 : index
    %c0_14 = arith.constant 0 : index
    %18 = vector.load %arg6[%c0_13, %c0_14] : memref<8x2xf32, #tpu.memory_space<vmem>>, vector<8x2xf32>
    tpu.vector_store %arg6[%c0_13, %c0_14], %17 {strides = array<i32>} : memref<8x2xf32, #tpu.memory_space<vmem>>, vector<8x2xf32>,
    return
  }
  func.func @transform_0(%arg0: i32) -> (i32, i32) {
    %c0_i32 = arith.constant 0 : i32
    %c0_i32_0 = arith.constant 0 : i32
    return %arg0, %c0_i32 : i32, i32
  }
  func.func @transform_1(%arg0: i32) -> (i32, i32) {
    %c0_i32 = arith.constant 0 : i32
    %c0_i32_0 = arith.constant 0 : i32
    %c0_i32_1 = arith.constant 0 : i32
    return %c0_i32, %c0_i32_0 : i32, i32
  }
  func.func @transform_2(%arg0: i32) -> (i32, i32) {
    %c0_i32 = arith.constant 0 : i32
    %c0_i32_0 = arith.constant 0 : i32
    %c0_i32_1 = arith.constant 0 : i32
    return %c0_i32, %c0_i32_0 : i32, i32
  }
  func.func @transform_3(%arg0: i32) -> (i32, i32) {
    %c0_i32 = arith.constant 0 : i32
    %c0_i32_0 = arith.constant 0 : i32
    %c0_i32_1 = arith.constant 0 : i32
    return %c0_i32, %c0_i32_0 : i32, i32
  }
  func.func @transform_4(%arg0: i32) -> (i32, i32) {
    %c0_i32 = arith.constant 0 : i32
    %c0_i32_0 = arith.constant 0 : i32
    %c0_i32_1 = arith.constant 0 : i32
    return %c0_i32, %c0_i32_0 : i32, i32
  }
  func.func @transform_5(%arg0: i32) -> (i32, i32) {
    %c0_i32 = arith.constant 0 : i32
    %c0_i32_0 = arith.constant 0 : i32
    return %arg0, %c0_i32 : i32, i32
  }
}

</mosaic_0001>

<bundles_post_ra>
// kernel: tpu_custom_call.1
= control target key start
LH: loop header
LB: loop body
LE: loop exit
PB: predicated region body
PF: predicated region fallthrough
CT: control target
= control target key end

     0   :  { %vm33_vm0 = vcmask 1043456   ;;  %vm29_vm1 = vcmask 31744   ;;  %v239_v0 = vmov 0.0   ;;  %vm240_vm2 = vmmov 0   ;;  %s298_s1 = inlined_call_operand.vmem [shape: f32[4,25], index: 1, kind: input, shape index: {}]   ;;  %s299_s0 = inlined_call_operand.vmem [shape: f32[8,4], index: 0, kind: input, shape index: {}]   ;;  %s300_s3 = inlined_call_operand.vmem [shape: f32[25,2], index: 3, kind: input, shape index: {}]   ;;  %s301_s2 = inlined_call_operand.vmem [shape: f32[1,25], index: 2, kind: input, shape index: {}]   ;;  %s302_s4 = inlined_call_operand.vmem [shape: f32[1,2], index: 4, kind: input, shape index: {}]   ;;  %s303_s5 = inlined_call_operand.vmem [shape: f32[8,2], index: 5, kind: output, shape index: {}]  }
   0x1   :  { %219 = vmatprep.subr.mxu0 %v239_v0  ;;  %v21_v1 = vld [vmem:[%s298_s1] sm:$0xf]  ;;  %221 = vmatprep.mubr.msk.f32.mxu0 %vm240_vm2, %v239_v0  ;;  %v114_v3 = vld [vmem:[%s300_s3 + $0x18] sm:$0x1]  ;;  %vm126_vm3 = vcmask 1040384   ;;  %v113_v4 = vld [vmem:[%s300_s3 + $0x10] sm:$0xff] }
   0x2   :  { %v20_v2 = vld [vmem:[%s299_s0] sm:$0xff]  ;;  %220 = vmatpush3.msk.msra.mxu0 %vm33_vm0, %v21_v1  ;;  %224 = vmatprep.subr.mxu1 %v239_v0  ;;  %v112_v5 = vld [vmem:[%s300_s3 + $0x8] sm:$0xff]  ;;  %vm122_vm4 = vcmask 203776   ;;  %vm200_vm5 = vcmask 15360  }
   0x3   :  { %222 = vmatmul.mubr.msk.f32.vlgmr.msra.gmra.mxu0 %vm29_vm1, %v20_v2  ;;  %232 = vmatprep.mubr.msk.f32.mxu1 %vm240_vm2, %v239_v0  ;;  %v111_v6 = vld [vmem:[%s300_s3] sm:$0xff] }
   0x4   :  { %225 = vmatpush3.msk.msra.mxu1 %vm126_vm3, %v114_v3  ;;  %v206_v7 = vld [vmem:[%s301_s2] ss:$0 sm:$0xff] }
   0x5   :  { %226 = vmatprep.subr.mxu1 %v239_v0  ;;  %v209_v15 = vld [vmem:[%s302_s4] ss:$0 sm:$0xff] }
   0x6   :  { %227 = vmatpush3.msra.mxu1 %v113_v4 }
   0x7   :  { %228 = vmatprep.subr.mxu1 %v239_v0 }
   0x8   :  { %229 = vmatpush3.msra.mxu1 %v112_v5 }
   0x9   :  { %230 = vmatprep.subr.mxu1 %v239_v0 }
   0xa   :  { %231 = vmatpush3.msra.mxu1 %v111_v6 }
  0xc3   :  { %v103_v8 = vpop.f32.mrf.mxu0 }
  0xc4   :  { %v104_v9 = vadd.f32 %v206_v7, %v103_v8 }
  0xc5   :  { %v223_v10 = vpop.f32.mrf.mxu0 }
  0xc6   :  { %v107_v11 = vmul.f32 0.5, %v104_v9 }
  0xc8   :  { %237 = vtanh.f32 %v107_v11 }
  0xd5   :  { %v238_v12 = vpop.eup %237 }
  0xd6   :  { %v109_v13 = vmul.f32 0.5, %v238_v12 }
  0xd8   :  { %v110_v14 = vadd.f32 0.5, %v109_v13 }
  0xda   :  { %233 = vmatmul.mubr.msk.f32.vlgmr.msra.gmra.mxu1 %vm122_vm4, %v110_v14 }
 0x19a   :  { %v196_v16 = vpop.f32.mrf.mxu1 }
 0x19b   :  { %v197_v17 = vadd.f32 %v209_v15, %v196_v16 }
 0x19c   :  { %v234_v18 = vpop.f32.mrf.mxu1 }
 0x19d   :  { %201 = vst.msk [vmem:[%s303_s5] sm:$0xff] %vm200_vm5, %v197_v17 }

</bundles_post_ra>
